<compile_context>
chip_gen: v5e
topology: v5e:2x2
jax: 0.10.0
libtpu: 0.0.40
codegen_flags: <defaults>
</compile_context>

<pallas_src>
import functools

import jax
import jax.numpy as jnp
import numpy as np
from jax import lax
from jax.experimental import pallas as pl
from jax.experimental.pallas import tpu as pltpu

# Fits comfortably under v7x's 64 MiB physical VMEM; far below v5e/v6e 128 MiB.
_VMEM_LIMIT_BYTES = 48 * 1024 * 1024


def _stats_kernel(bid_row_ref, x_ref, s1_ref, s2_ref, *, n_total, tile_n,
                  num_graphs, gn_per_split, need_mask):
    """Accumulate per-graph sum(x) and sum(x*x) over node tiles.

    grid = (n_splits, d_tiles, node_tiles_per_split); axis 2 is the reduction.
    bid_row_ref : (1, tile_n) int32   graph id of each node in this tile
    x_ref       : (tile_n, tile_d)    node features
    s1/s2_ref   : (B, tile_d) f32     resident accumulators (one per split)
    """
    k = pl.program_id(2)

    @pl.when(k == 0)
    def _():
        s1_ref[...] = jnp.zeros_like(s1_ref)
        s2_ref[...] = jnp.zeros_like(s2_ref)

    # f32 on purpose: x*x feeds the one-pass variance (precision).
    x = x_ref[...].astype(jnp.float32)                        # (tile_n, tile_d)

    if need_mask:
        # Logical node-tile index (un-clamped) -> rows past N (padded rows of a
        # partial tile, or whole duplicated/clamped tiles) are zeroed and never
        # contribute to the reduction.
        tile_idx = pl.program_id(0) * gn_per_split + k
        row = tile_idx * tile_n + lax.broadcasted_iota(jnp.int32, (tile_n, 1), 0)
        x = jnp.where(row < n_total, x, 0.0)

    # One-hot^T segment matrix built from the int32 graph ids.
    bid = bid_row_ref[...]                                    # (1, tile_n)
    gid = lax.broadcasted_iota(jnp.int32, (num_graphs, tile_n), 0)
    onehot_t = (bid == gid).astype(jnp.float32)               # (B, tile_n)

    s1_ref[...] += jnp.dot(onehot_t, x, preferred_element_type=jnp.float32)
    s2_ref[...] += jnp.dot(onehot_t, x * x, preferred_element_type=jnp.float32)


def _apply_kernel(bid_row_ref, x_ref, scale_ref, shift_ref, out_ref, *,
                  num_graphs):
    """out = x * scale[batch_id] + shift[batch_id]  (fused affine, no divide)."""
    x = x_ref[...].astype(jnp.float32)                        # (tile_n, tile_d)
    bid = bid_row_ref[...]                                    # (1, tile_n)
    tile_n = x.shape[0]
    gid = lax.broadcasted_iota(jnp.int32, (num_graphs, tile_n), 0)
    onehot_t = (bid == gid).astype(jnp.float32)               # (B, tile_n)

    # Contract the B axis: (B, tile_n) . (B, tile_d) -> (tile_n, tile_d).
    dn = (((0,), (0,)), ((), ()))
    row_scale = lax.dot_general(onehot_t, scale_ref[...], dn,
                                preferred_element_type=jnp.float32)
    row_shift = lax.dot_general(onehot_t, shift_ref[...], dn,
                                preferred_element_type=jnp.float32)
    out_ref[...] = (x * row_scale + row_shift).astype(out_ref.dtype)


def graph_norm(feats, batch_num_nodes, weight, bias, mean_scale, eps=1e-5):
    """GraphNorm forward.

    feats            : [N, D]  ragged concatenation of all graphs' node feats
    batch_num_nodes  : [B]     int32, #nodes per graph (sums to N)
    weight/bias/ms   : [D]
    returns          : [N, D]
    """
    feats = jnp.asarray(feats)
    n_total, d = feats.shape
    num_nodes = jnp.asarray(batch_num_nodes, dtype=jnp.int32)
    b = int(num_nodes.shape[0])
    elem_bytes = feats.dtype.itemsize

    # Big lane-dense tiles: both passes are HBM-bound, larger tiles amortize the
    # ~0.35us/step overhead and keep stores dense.  (1024, 1024) f32 blocks,
    # double-buffered in+out, stay well inside the 48 MiB VMEM limit.
    tile_n = n_total if n_total <= 1024 else 1024
    tile_d = d if d <= 1024 else 1024
    gn = pl.cdiv(n_total, tile_n)
    gd = pl.cdiv(d, tile_d)

    # Give v7x's second TensorCore work in pass 1 when the feature grid is
    # 1-wide: split the node reduction across a leading "parallel" grid axis.
    n_splits = 2 if (gd == 1 and gn >= 2) else 1
    gn_per_split = pl.cdiv(gn, n_splits)
    need_mask = (n_splits * gn_per_split * tile_n) != n_total

    # Tiny per-node graph-id vector (O(N) int32) -- shared by both passes.
    batch_id = jnp.repeat(jnp.arange(b, dtype=jnp.int32), num_nodes,
                          total_repeat_length=n_total)
    bid_row = batch_id.reshape(1, n_total)

    def _node_tile(s, k):
        # Clamp so the DMA window stays in bounds; duplicated tiles are
        # zero-masked inside the kernel via the logical (un-clamped) index.
        return jnp.minimum(s * gn_per_split + k, gn - 1)

    # ---- pass 1: per-graph sum(x), sum(x*x) ---------------------------------
    stats_kernel = functools.partial(
        _stats_kernel, n_total=n_total, tile_n=tile_n, num_graphs=b,
        gn_per_split=gn_per_split, need_mask=need_mask)
    s1p, s2p = pl.pallas_call(
        stats_kernel,
        out_shape=(jax.ShapeDtypeStruct((n_splits, b, d), jnp.float32),
                   jax.ShapeDtypeStruct((n_splits, b, d), jnp.float32)),
        grid_spec=pltpu.PrefetchScalarGridSpec(
            num_scalar_prefetch=0,
            grid=(n_splits, gd, gn_per_split),
            in_specs=[
                pl.BlockSpec((1, tile_n),
                             lambda s, dj, k: (0, _node_tile(s, k))),
                pl.BlockSpec((tile_n, tile_d),
                             lambda s, dj, k: (_node_tile(s, k), dj)),
            ],
            out_specs=[
                pl.BlockSpec((None, b, tile_d), lambda s, dj, k: (s, 0, dj)),
                pl.BlockSpec((None, b, tile_d), lambda s, dj, k: (s, 0, dj)),
            ]),
        compiler_params=pltpu.CompilerParams(
            dimension_semantics=("parallel", "parallel", "arbitrary"),
            vmem_limit_bytes=_VMEM_LIMIT_BYTES),
        cost_estimate=pl.CostEstimate(
            flops=4 * b * n_total * d + 2 * n_total * d,
            transcendentals=0,
            bytes_accessed=n_total * d * elem_bytes + 4 * n_total
            + 8 * n_splits * b * d),
    )(bid_row, feats)
    s1 = jnp.sum(s1p, axis=0)                                 # (B, D)
    s2 = jnp.sum(s2p, axis=0)

    # ---- O(B*D) finalisation: fused per-graph affine (plain JAX, negligible) -
    # E[(x - mean*ms)^2] = E[x^2] + mean^2 * ms * (ms - 2)
    n_f = num_nodes.astype(jnp.float32)
    inv_n = 1.0 / jnp.maximum(n_f, 1.0)[:, None]              # guard n == 0
    mean = s1 * inv_n                                         # (B, D)
    ms = mean_scale.astype(jnp.float32)[None, :]
    var = jnp.maximum(s2 * inv_n + mean * mean * ms * (ms - 2.0), 0.0)
    inv_std = lax.rsqrt(var + eps)
    scale = weight.astype(jnp.float32)[None, :] * inv_std     # (B, D)
    shift = bias.astype(jnp.float32)[None, :] - mean * ms * scale

    # ---- pass 2: out = x * scale[batch_id] + shift[batch_id] ----------------
    # Feature tiles outer, node tiles inner: scale/shift block index is
    # constant across the inner loop (no re-DMA per node tile).
    apply_kernel = functools.partial(_apply_kernel, num_graphs=b)
    out = pl.pallas_call(
        apply_kernel,
        out_shape=jax.ShapeDtypeStruct((n_total, d), feats.dtype),
        grid_spec=pltpu.PrefetchScalarGridSpec(
            num_scalar_prefetch=0,
            grid=(gd, gn),
            in_specs=[
                pl.BlockSpec((1, tile_n), lambda dj, i: (0, i)),
                pl.BlockSpec((tile_n, tile_d), lambda dj, i: (i, dj)),
                pl.BlockSpec((b, tile_d), lambda dj, i: (0, dj)),
                pl.BlockSpec((b, tile_d), lambda dj, i: (0, dj)),
            ],
            out_specs=pl.BlockSpec((tile_n, tile_d), lambda dj, i: (i, dj))),
        compiler_params=pltpu.CompilerParams(
            dimension_semantics=("parallel", "parallel"),
            vmem_limit_bytes=_VMEM_LIMIT_BYTES),
        cost_estimate=pl.CostEstimate(
            flops=4 * b * n_total * d + 2 * n_total * d,
            transcendentals=0,
            bytes_accessed=2 * n_total * d * elem_bytes + 4 * n_total
            + 8 * b * d),
    )(bid_row, feats, scale, shift)
    return out


def graph_norm_ref(feats, batch_num_nodes, weight, bias, mean_scale, eps=1e-5):
    """Pure-JAX reference matching the PyTorch/DGL forward."""
    n_total, _ = feats.shape
    num_nodes = jnp.asarray(batch_num_nodes, dtype=jnp.int32)
    b = int(num_nodes.shape[0])
    batch_id = jnp.repeat(jnp.arange(b), num_nodes, total_repeat_length=n_total)
    n_f = num_nodes.astype(jnp.float32)

    mean = jax.ops.segment_sum(feats, batch_id, num_segments=b) / n_f[:, None]
    demean = feats - mean[batch_id] * mean_scale
    var = jax.ops.segment_sum(demean ** 2, batch_id, num_segments=b) / n_f[:, None]
    std = jnp.sqrt(var + eps)
    return weight * demean / std[batch_id] + bias


def _run_case(key, batch_num_nodes, hidden, default_params):
    k1, k2, k3, k4 = jax.random.split(key, 4)
    n_total = int(np.sum(np.asarray(batch_num_nodes)))
    feats = jax.random.normal(k1, (n_total, hidden), dtype=jnp.float32)
    if default_params:
        weight = jnp.ones((hidden,), jnp.float32)
        bias = jnp.zeros((hidden,), jnp.float32)
        mean_scale = jnp.ones((hidden,), jnp.float32)
    else:
        weight = jax.random.normal(k2, (hidden,), jnp.float32)
        bias = jax.random.normal(k3, (hidden,), jnp.float32)
        mean_scale = jax.random.normal(k4, (hidden,), jnp.float32)

    out = jax.block_until_ready(
        graph_norm(feats, batch_num_nodes, weight, bias, mean_scale))
    ref = graph_norm_ref(feats, batch_num_nodes, weight, bias, mean_scale)
    np.testing.assert_allclose(np.asarray(out), np.asarray(ref),
                               rtol=1e-4, atol=1e-4)


if __name__ == "__main__":
    key = jax.random.PRNGKey(0)
    k1, k2, k3 = jax.random.split(key, 3)

    # case 1: module-default params, single small tile (N=16, D=32)
    _run_case(k1, jnp.array([5, 8, 3], dtype=jnp.int32), 32,
              default_params=True)

    # case 2: non-trivial params, one full tile (N=400, D=64)
    _run_case(k2, jnp.array([130, 200, 70], dtype=jnp.int32), 64,
              default_params=False)

    # case 3: N > tile_n -> exercises the 2-way node split, the clamped
    # duplicate tile (odd tile count) and partial-tile masking (N=2500, D=32)
    _run_case(k3, jnp.array([900, 1100, 500], dtype=jnp.int32), 32,
              default_params=False)

    print("KERNEL_OK")
</pallas_src>

<mosaic_0001>
module attributes {stable_mosaic.version = 11 : i64} {
  func.func @_stats_kernel(%arg0: i32, %arg1: i32, %arg2: i32, %arg3: memref<1x16xi32, #tpu.memory_space<vmem>>, %arg4: memref<16x32xf32, #tpu.memory_space<vmem>>, %arg5: memref<1x3x32xf32, #tpu.memory_space<vmem>>, %arg6: memref<1x3x32xf32, #tpu.memory_space<vmem>>) attributes {dimension_semantics = [#tpu.dimension_semantics<parallel>, #tpu.dimension_semantics<parallel>, #tpu.dimension_semantics<arbitrary>], iteration_bounds = array<i64: 1, 1, 1>, scalar_prefetch = 0 : i64, scratch_operands = 0 : i64, tpu.core_type = #tpu.core_type<tc>, window_params = [{transform_indices = @transform_0, window_bounds = array<i64: 1, 16>}, {transform_indices = @transform_1, window_bounds = array<i64: 16, 32>}, {transform_indices = @transform_2, window_bounds = array<i64: 1, 3, 32>}, {transform_indices = @transform_3, window_bounds = array<i64: 1, 3, 32>}]} {
    %c0_i32 = arith.constant 0 : i32
    %0 = arith.cmpi eq, %arg2, %c0_i32 : i32
    %1 = arith.extui %0 : i1 to i32
    %c0_i32_0 = arith.constant 0 : i32
    %2 = arith.cmpi ne, %1, %c0_i32_0 : i32
    scf.if %2 {
      %cst_17 = arith.constant 0.000000e+00 : f32
      %25 = vector.broadcast %cst_17 : f32 to vector<3x32xf32>
      %c0_18 = arith.constant 0 : index
      %c0_19 = arith.constant 0 : index
      %c0_20 = arith.constant 0 : index
      %26 = vector.load %arg5[%c0_18, %c0_19, %c0_20] : memref<1x3x32xf32, #tpu.memory_space<vmem>>, vector<1x3x32xf32>
      %27 = vector.shape_cast %26 : vector<1x3x32xf32> to vector<3x32xf32>
      %28 = vector.shape_cast %25 : vector<3x32xf32> to vector<1x3x32xf32>
      tpu.vector_store %arg5[%c0_18, %c0_19, %c0_20], %28 {strides = array<i32>} : memref<1x3x32xf32, #tpu.memory_space<vmem>>, vector<1x3x32xf32>,
      %cst_21 = arith.constant 0.000000e+00 : f32
      %29 = vector.broadcast %cst_21 : f32 to vector<3x32xf32>
      %c0_22 = arith.constant 0 : index
      %c0_23 = arith.constant 0 : index
      %c0_24 = arith.constant 0 : index
      %30 = vector.load %arg6[%c0_22, %c0_23, %c0_24] : memref<1x3x32xf32, #tpu.memory_space<vmem>>, vector<1x3x32xf32>
      %31 = vector.shape_cast %30 : vector<1x3x32xf32> to vector<3x32xf32>
      %32 = vector.shape_cast %29 : vector<3x32xf32> to vector<1x3x32xf32>
      tpu.vector_store %arg6[%c0_22, %c0_23, %c0_24], %32 {strides = array<i32>} : memref<1x3x32xf32, #tpu.memory_space<vmem>>, vector<1x3x32xf32>,
    } else {
    }
    %c0 = arith.constant 0 : index
    %c0_1 = arith.constant 0 : index
    %3 = vector.load %arg4[%c0, %c0_1] : memref<16x32xf32, #tpu.memory_space<vmem>>, vector<16x32xf32>
    %c0_2 = arith.constant 0 : index
    %c0_3 = arith.constant 0 : index
    %4 = vector.load %arg3[%c0_2, %c0_3] : memref<1x16xi32, #tpu.memory_space<vmem>>, vector<1x16xi32>
    %5 = tpu.iota {dimensions = array<i32: 0>} : vector<3x16xi32>
    %6 = vector.broadcast %4 : vector<1x16xi32> to vector<3x16xi32>
    %7 = arith.cmpi eq, %6, %5 : vector<3x16xi32>
    %8 = arith.extui %7 : vector<3x16xi1> to vector<3x16xi32>
    %9 = arith.sitofp %8 : vector<3x16xi32> to vector<3x16xf32>
    %c0_4 = arith.constant 0 : index
    %c0_5 = arith.constant 0 : index
    %c0_6 = arith.constant 0 : index
    %10 = vector.load %arg5[%c0_4, %c0_5, %c0_6] : memref<1x3x32xf32, #tpu.memory_space<vmem>>, vector<1x3x32xf32>
    %11 = vector.shape_cast %10 : vector<1x3x32xf32> to vector<3x32xf32>
    %cst = arith.constant dense<0.000000e+00> : vector<3x32xf32>
    %12 = tpu.matmul %9, %3, %cst {dimension_numbers = #tpu.dot_dimension_numbers<[1], [0], [0], [1], [0, 0, 1, 1], [], []>} : vector<3x16xf32>, vector<16x32xf32>, vector<3x32xf32> -> vector<3x32xf32>
    %13 = arith.addf %11, %12 : vector<3x32xf32>
    %c0_7 = arith.constant 0 : index
    %c0_8 = arith.constant 0 : index
    %c0_9 = arith.constant 0 : index
    %14 = vector.load %arg5[%c0_7, %c0_8, %c0_9] : memref<1x3x32xf32, #tpu.memory_space<vmem>>, vector<1x3x32xf32>
    %15 = vector.shape_cast %14 : vector<1x3x32xf32> to vector<3x32xf32>
    %16 = vector.shape_cast %13 : vector<3x32xf32> to vector<1x3x32xf32>
    tpu.vector_store %arg5[%c0_7, %c0_8, %c0_9], %16 {strides = array<i32>} : memref<1x3x32xf32, #tpu.memory_space<vmem>>, vector<1x3x32xf32>,
    %c0_10 = arith.constant 0 : index
    %c0_11 = arith.constant 0 : index
    %c0_12 = arith.constant 0 : index
    %17 = vector.load %arg6[%c0_10, %c0_11, %c0_12] : memref<1x3x32xf32, #tpu.memory_space<vmem>>, vector<1x3x32xf32>
    %18 = vector.shape_cast %17 : vector<1x3x32xf32> to vector<3x32xf32>
    %19 = arith.mulf %3, %3 : vector<16x32xf32>
    %cst_13 = arith.constant dense<0.000000e+00> : vector<3x32xf32>
    %20 = tpu.matmul %9, %19, %cst_13 {dimension_numbers = #tpu.dot_dimension_numbers<[1], [0], [0], [1], [0, 0, 1, 1], [], []>} : vector<3x16xf32>, vector<16x32xf32>, vector<3x32xf32> -> vector<3x32xf32>
    %21 = arith.addf %18, %20 : vector<3x32xf32>
    %c0_14 = arith.constant 0 : index
    %c0_15 = arith.constant 0 : index
    %c0_16 = arith.constant 0 : index
    %22 = vector.load %arg6[%c0_14, %c0_15, %c0_16] : memref<1x3x32xf32, #tpu.memory_space<vmem>>, vector<1x3x32xf32>
    %23 = vector.shape_cast %22 : vector<1x3x32xf32> to vector<3x32xf32>
    %24 = vector.shape_cast %21 : vector<3x32xf32> to vector<1x3x32xf32>
    tpu.vector_store %arg6[%c0_14, %c0_15, %c0_16], %24 {strides = array<i32>} : memref<1x3x32xf32, #tpu.memory_space<vmem>>, vector<1x3x32xf32>,
    return
  }
  func.func @transform_0(%arg0: i32, %arg1: i32, %arg2: i32) -> (i32, i32) {
    %c1_i32 = arith.constant 1 : i32
    %0 = arith.muli %arg0, %c1_i32 : i32
    %1 = arith.addi %0, %arg2 : i32
    %c0_i32 = arith.constant 0 : i32
    %2 = arith.minsi %1, %c0_i32 : i32
    %c0_i32_0 = arith.constant 0 : i32
    %c0_i32_1 = arith.constant 0 : i32
    return %c0_i32_0, %2 : i32, i32
  }
  func.func @transform_1(%arg0: i32, %arg1: i32, %arg2: i32) -> (i32, i32) {
    %c1_i32 = arith.constant 1 : i32
    %0 = arith.muli %arg0, %c1_i32 : i32
    %1 = arith.addi %0, %arg2 : i32
    %c0_i32 = arith.constant 0 : i32
    %2 = arith.minsi %1, %c0_i32 : i32
    %c0_i32_0 = arith.constant 0 : i32
    return %2, %arg1 : i32, i32
  }
  func.func @transform_2(%arg0: i32, %arg1: i32, %arg2: i32) -> (i32, i32, i32) {
    %c0_i32 = arith.constant 0 : i32
    %c0_i32_0 = arith.constant 0 : i32
    return %arg0, %c0_i32, %arg1 : i32, i32, i32
  }
  func.func @transform_3(%arg0: i32, %arg1: i32, %arg2: i32) -> (i32, i32, i32) {
    %c0_i32 = arith.constant 0 : i32
    %c0_i32_0 = arith.constant 0 : i32
    return %arg0, %c0_i32, %arg1 : i32, i32, i32
  }
}

</mosaic_0001>

<bundles_post_ra>
// kernel: tpu_custom_call.1
= control target key start
LH: loop header
LB: loop body
LE: loop exit
PB: predicated region body
PF: predicated region fallthrough
CT: control target
= control target key end

     0   :  { %9 = vsyncpa [#allocation3], 0  ;;  %s256_s0 = inlined_call_operand.hbm [shape: s32[1,16], index: 0, kind: input, shape index: {}]   ;;  %s257_s1 = inlined_call_operand.hbm [shape: f32[16,32], index: 1, kind: input, shape index: {}]   ;;  %s258_s2 = inlined_call_operand.vmem [shape: f32[1,3,32], index: 2, kind: output, shape index: {0}]   ;;  %s259_s3 = inlined_call_operand.vmem [shape: f32[1,3,32], index: 3, kind: output, shape index: {1}]  }
   0x1   :  { %s20_s14 = sshll.u32 %s256_s0, 4  ;;  %s21_s14 = int_to_ptr.hbm [resolvable:$true] %s20_s14 }
   0x2   :  { %10 = vsyncpa [#allocation5], 0  ;;  %s203_s15 = smov [#allocation2]   ;;  %s36_s19 = sshll.u32 %s257_s1, 4  ;;  %s37_s19 = int_to_ptr.hbm [resolvable:$true] %s36_s19 }
   0x3   :  { %s22_s16 = sshll.u32 %s203_s15, 4  ;;  %s204_s20 = smov [#allocation4]   ;;  %s23_s16 = int_to_ptr.vmem [resolvable:$true] %s22_s16 }
   0x4   :  { %25 = dma.hbm_to_vmem [thread:$0]  %s21_s14, 16, %s23_s16, [#allocation3]  }
   0x5   :  { %s38_s21 = sshll.u32 %s204_s20, 4  ;;  %s205_s22 = smov 128   ;;  %s39_s21 = int_to_ptr.vmem [resolvable:$true] %s38_s21 }
   0x6   :  { %s206_s23 = smov 8  }
   0x7   :  { %44 = dma.hbm_to_vmem [thread:$0]  %s37_s19, 256, %s39_s21, [#allocation5], %s205_s22, %s205_s22, %s206_s23  }
   0x8   :  { %199 = dma.done.wait [#allocation3], 16  }
   0x9   :  { %200 = vsyncadd [#allocation3], 4294967280 }
   0xa   :  { %201 = dma.done.wait [#allocation5], 256  }
   0xb   :  { %202 = vsyncadd [#allocation5], 4294967040  ;;  %vm64_vm0 = vcmask 256000   ;;  %v207_v0 = vmov 0.0   ;;  %v70_v1 = vlaneseq  ;;  %v68_v3 = vld [vmem:[#allocation4 + $0x8] sm:$0xff]  ;;  %v67_v4 = vld [vmem:[#allocation4] sm:$0xff] }
   0xc   :  { %65 = vst.msk [vmem:[%s258_s2] sm:$0x7] %vm64_vm0, %v207_v0  ;;  %95 = vmatpush.msra.mxu0 %v68_v3  ;;  %v106_v5 = vmul.f32 %v68_v3, %v68_v3  ;;  %v105_v6 = vmul.f32 %v67_v4, %v67_v4  ;;  %v150_v7 = vld [vmem:[#allocation2] ss:$0 sm:$0xff]  ;;  %vm77_vm1 = vcmask 130048  }
   0xd   :  { %66 = vst.msk [vmem:[%s259_s3] sm:$0x7] %vm64_vm0, %v207_v0  ;;  %v71_v2 = vshrl.u32 %v70_v1, 7 }
   0xe   :  { %121 = vmatpush.msra.mxu1 %v106_v5  ;;  %96 = vmatpush.msra.mxu0 %v67_v4 }
   0xf   :  { %vm73_vm2 = vcmp.eq.s32.totalorder %v150_v7, %v71_v2 }
  0x10   :  { %v142_v8 = vsel %vm73_vm2, 1.0, %v207_v0  ;;  %122 = vmatpush.msra.mxu1 %v105_v6 }
  0x11   :  { %143 = vmatmul.msk.f32.vlgmr.msra.gmra.mxu0 %vm77_vm1, %v142_v8  ;;  %144 = vmatmul.msk.f32.vlgmr.msra.gmra.mxu1 %vm77_vm1, %v142_v8 }
  0x13   :  { %v76_v9 = vld [vmem:[%s258_s2] sm:$0x7] }
  0x14   :  { %v104_v10 = vld [vmem:[%s259_s3] sm:$0x7] }
  0x8e   :  { %v98_v11 = vpop.f32.mrf.mxu0  ;;  %v124_v13 = vpop.f32.mrf.mxu1 }
  0x8f   :  { %v101_v12 = vadd.f32 %v98_v11, %v76_v9  ;;  %v127_v14 = vadd.f32 %v124_v13, %v104_v10 }
  0x91   :  { %103 = vst.msk [vmem:[%s258_s2] sm:$0x7] %vm64_vm0, %v101_v12 }
  0x92   :  { %128 = vst.msk [vmem:[%s259_s3] sm:$0x7] %vm64_vm0, %v127_v14 }
  0x93   :  { %137 = vsyncpa [#allocation3], 1 }
  0x94   :  { %138 = vsyncpa [#allocation5], 1 }

</bundles_post_ra>
